<compile_context>
chip_gen: v5e
topology: v5e:2x2
jax: 0.10.0
libtpu: 0.0.40
codegen_flags: <defaults>
</compile_context>

<pallas_src>
import numpy as np
import jax
import jax.numpy as jnp
from jax.experimental import pallas as pl
from jax.experimental.pallas import tpu as pltpu

# ---- static configuration (small, consistent with the module) ---------------
B = 2
N = 8                       # tokens (incl. class token)
DIM = 32                    # C
NUM_HEADS = 4
HEAD_DIM = DIM // NUM_HEADS
HD = NUM_HEADS * HEAD_DIM   # head_dim * num_heads
QKV_PAD = 128               # fused [k | v | q | zero-pad] output lanes (one vreg wide)
SCALE = HEAD_DIM ** -0.5


def class_attention_kernel(x_ref, wqkv_ref, hb_ref, wp_ref, bp_ref, o_ref):
    x = x_ref[...]                                       # (B, N, C)
    x_flat = x.reshape(B * N, DIM)                       # leading-dim merge (cheap)

    # Fused kv + q projection: one MXU matmul, 128 output lanes = [k | v | q | pad].
    qkv = jnp.dot(x_flat, wqkv_ref[...],
                  preferred_element_type=jnp.float32)    # (B*N, 128)
    qkv = qkv.reshape(B, N, QKV_PAD)                     # single leading-dim split

    k = qkv[:, :, :HD]                                   # (B, N, HD)
    v = qkv[:, :, HD:2 * HD]                             # (B, N, HD)
    q = qkv[:, 0, 2 * HD:3 * HD] * SCALE                 # (B, HD) class-token query

    # Per-head logits without splitting the lane axis:
    #   prod[b, n, h*Dh + d] = q[b, h*Dh + d] * k[b, n, h*Dh + d]
    # One matmul against the constant block-diagonal head mask sums over d
    # within each head and leaves the logit replicated across that head's lanes.
    prod = q[:, None, :] * k                             # (B, N, HD) VPU broadcast-mul
    logits = jnp.dot(prod.reshape(B * N, HD), hb_ref[...],
                     preferred_element_type=jnp.float32).reshape(B, N, HD)

    # Softmax over tokens (axis=1), vectorized over batch and all heads at once.
    m = jnp.max(logits, axis=1, keepdims=True)           # (B, 1, HD)
    e = jnp.exp(logits - m)
    s = jnp.sum(e, axis=1, keepdims=True)                # (B, 1, HD)
    p = e * pl.reciprocal(s, approx=True)                # EUP slot, ~free

    # attn @ v, fully lane-parallel (heads stay concatenated on the lane axis).
    ctx = jnp.sum(p * v, axis=1)                         # (B, HD)

    # Output projection (+ bias) for the class embedding only.
    out = jnp.dot(ctx, wp_ref[...],
                  preferred_element_type=jnp.float32) + bp_ref[...]   # (B, C)
    o_ref[...] = out.astype(o_ref.dtype)                 # (B, C) lane-dense slab


def prepare_fused_weights(params):
    """Host-side prep: fuse kv+q weights (padded to 128 lanes) and build the
    block-diagonal head-sum mask as a trace-time constant."""
    wqkv = jnp.concatenate([params["wkv"], params["wq"]], axis=1)    # (DIM, 3*HD)
    if QKV_PAD > 3 * HD:
        wqkv = jnp.pad(wqkv, ((0, 0), (0, QKV_PAD - 3 * HD)))
    head_block = jnp.asarray(
        np.kron(np.eye(NUM_HEADS, dtype=np.float32),
                np.ones((HEAD_DIM, HEAD_DIM), dtype=np.float32)))    # (HD, HD)
    return wqkv, head_block


def class_attention_forward(x, params):
    # TODO(synk): when used per-layer in a real model, batch many instances
    # along a leading 'parallel' grid axis of one pallas_call (or fuse with the
    # surrounding MLP) -- at this size the launch cost dominates the kernel.
    Bb, Nn, Cc = x.shape
    wqkv, head_block = prepare_fused_weights(params)
    wp, bp = params["wp"], params["bp"]

    # Advisory cost for XLA's scheduler (this call is launch-overhead-bound).
    flops = (2 * Bb * Nn * Cc * QKV_PAD        # fused qkv matmul
             + 2 * Bb * Nn * HD * HD           # head-sum matmul
             + 2 * Bb * HD * Cc)               # proj matmul
    transcendentals = Bb * Nn * HD + Bb * HD   # exp + approx reciprocal
    bytes_accessed = 4 * (x.size + wqkv.size + head_block.size
                          + wp.size + bp.size + Bb * Cc)

    vmem_spec = pl.BlockSpec(memory_space=pltpu.MemorySpace.VMEM)
    out = pl.pallas_call(
        class_attention_kernel,
        out_shape=jax.ShapeDtypeStruct((Bb, Cc), x.dtype),
        in_specs=[vmem_spec, vmem_spec, vmem_spec, vmem_spec, vmem_spec],
        out_specs=vmem_spec,
        cost_estimate=pl.CostEstimate(flops=flops,
                                      transcendentals=transcendentals,
                                      bytes_accessed=bytes_accessed),
    )(x, wqkv, head_block, wp, bp)
    return out.reshape(Bb, 1, Cc)


def init_params(key):
    ks = jax.random.split(key, 4)

    def nrm(k, shape, scale=0.05):
        return scale * jax.random.normal(k, shape, jnp.float32)

    return dict(
        wkv=nrm(ks[0], (DIM, 2 * HD)),   # ClassAttention.kv (qkv_bias=False)
        wq=nrm(ks[1], (DIM, HD)),        # ClassAttention.q  (qkv_bias=False)
        wp=nrm(ks[2], (HD, DIM)),        # ClassAttention.proj weight
        bp=nrm(ks[3], (1, DIM)),         # ClassAttention.proj bias
    )


def reference_forward(x, p):
    # Pure-JAX reference mirroring the PyTorch ClassAttention module.
    hp = jax.lax.Precision.HIGHEST
    Bb, Nn, Cc = x.shape
    kv = jnp.einsum("bnc,cd->bnd", x, p["wkv"], precision=hp)
    k = kv[..., :HD].reshape(Bb, Nn, NUM_HEADS, HEAD_DIM)
    v = kv[..., HD:].reshape(Bb, Nn, NUM_HEADS, HEAD_DIM)
    q = jnp.einsum("bnc,cd->bnd", x[:, :1], p["wq"], precision=hp)
    q = q.reshape(Bb, 1, NUM_HEADS, HEAD_DIM) * SCALE
    attn = jnp.einsum("bqhd,bkhd->bhqk", q, k, precision=hp)
    attn = jax.nn.softmax(attn, axis=-1)
    cls = jnp.einsum("bhqk,bkhd->bqhd", attn, v, precision=hp).reshape(Bb, 1, HD)
    cls = jnp.einsum("bqc,cd->bqd", cls, p["wp"], precision=hp) + p["bp"][0]
    return cls


if __name__ == "__main__":
    key = jax.random.PRNGKey(0)
    kx, kp = jax.random.split(key)
    x = jax.random.normal(kx, (B, N, DIM), jnp.float32)
    params = init_params(kp)

    out = class_attention_forward(x, params)
    out = jax.block_until_ready(out)

    ref = reference_forward(x, params)
    np.testing.assert_allclose(np.asarray(out), np.asarray(ref),
                               rtol=5e-3, atol=5e-3)

    print("KERNEL_OK")
</pallas_src>

<mosaic_0001>
module attributes {stable_mosaic.version = 11 : i64} {
  func.func @class_attention_kernel(%arg0: memref<2x8x32xf32, #tpu.memory_space<vmem>>, %arg1: memref<32x128xf32, #tpu.memory_space<vmem>>, %arg2: memref<32x32xf32, #tpu.memory_space<vmem>>, %arg3: memref<32x32xf32, #tpu.memory_space<vmem>>, %arg4: memref<1x32xf32, #tpu.memory_space<vmem>>, %arg5: memref<2x32xf32, #tpu.memory_space<vmem>>) attributes {dimension_semantics = [], scalar_prefetch = 0 : i64, scratch_operands = 0 : i64, tpu.core_type = #tpu.core_type<tc>} {
    %c0 = arith.constant 0 : index
    %c0_0 = arith.constant 0 : index
    %c0_1 = arith.constant 0 : index
    %0 = vector.load %arg0[%c0, %c0_0, %c0_1] : memref<2x8x32xf32, #tpu.memory_space<vmem>>, vector<2x8x32xf32>
    %1 = vector.shape_cast %0 : vector<2x8x32xf32> to vector<16x32xf32>
    %c0_2 = arith.constant 0 : index
    %c0_3 = arith.constant 0 : index
    %2 = vector.load %arg1[%c0_2, %c0_3] : memref<32x128xf32, #tpu.memory_space<vmem>>, vector<32x128xf32>
    %cst = arith.constant dense<0.000000e+00> : vector<16x128xf32>
    %3 = tpu.matmul %1, %2, %cst {dimension_numbers = #tpu.dot_dimension_numbers<[1], [0], [0], [1], [0, 0, 1, 1], [], []>} : vector<16x32xf32>, vector<32x128xf32>, vector<16x128xf32> -> vector<16x128xf32>
    %4 = vector.shape_cast %3 : vector<16x128xf32> to vector<2x8x128xf32>
    %5 = vector.extract_strided_slice %4 {offsets = [0, 0, 0], sizes = [2, 8, 32], strides = [1, 1, 1]} : vector<2x8x128xf32> to vector<2x8x32xf32>
    %6 = vector.extract_strided_slice %4 {offsets = [0, 0, 32], sizes = [2, 8, 32], strides = [1, 1, 1]} : vector<2x8x128xf32> to vector<2x8x32xf32>
    %7 = vector.extract_strided_slice %4 {offsets = [0, 0, 64], sizes = [2, 1, 32], strides = [1, 1, 1]} : vector<2x8x128xf32> to vector<2x1x32xf32>
    %8 = vector.shape_cast %7 : vector<2x1x32xf32> to vector<2x32xf32>
    %cst_4 = arith.constant 0.353553385 : f32
    %9 = vector.broadcast %cst_4 : f32 to vector<2x32xf32>
    %10 = arith.mulf %8, %9 : vector<2x32xf32>
    %11 = vector.shape_cast %10 : vector<2x32xf32> to vector<2x1x32xf32>
    %12 = vector.broadcast %11 : vector<2x1x32xf32> to vector<2x8x32xf32>
    %13 = arith.mulf %12, %5 : vector<2x8x32xf32>
    %14 = vector.shape_cast %13 : vector<2x8x32xf32> to vector<16x32xf32>
    %c0_5 = arith.constant 0 : index
    %c0_6 = arith.constant 0 : index
    %15 = vector.load %arg2[%c0_5, %c0_6] : memref<32x32xf32, #tpu.memory_space<vmem>>, vector<32x32xf32>
    %cst_7 = arith.constant dense<0.000000e+00> : vector<16x32xf32>
    %16 = tpu.matmul %14, %15, %cst_7 {dimension_numbers = #tpu.dot_dimension_numbers<[1], [0], [0], [1], [0, 0, 1, 1], [], []>} : vector<16x32xf32>, vector<32x32xf32>, vector<16x32xf32> -> vector<16x32xf32>
    %17 = vector.shape_cast %16 : vector<16x32xf32> to vector<2x8x32xf32>
    %cst_8 = arith.constant dense<0xFF800000> : vector<2x32xf32>
    %18 = vector.multi_reduction <maximumf>, %17, %cst_8 [1] : vector<2x8x32xf32> to vector<2x32xf32>
    %19 = vector.shape_cast %18 : vector<2x32xf32> to vector<2x1x32xf32>
    %20 = vector.broadcast %19 : vector<2x1x32xf32> to vector<2x8x32xf32>
    %21 = arith.subf %17, %20 : vector<2x8x32xf32>
    %22 = math.exp %21 : vector<2x8x32xf32>
    %cst_9 = arith.constant dense<0.000000e+00> : vector<2x32xf32>
    %23 = vector.multi_reduction <add>, %22, %cst_9 [1] : vector<2x8x32xf32> to vector<2x32xf32>
    %24 = vector.shape_cast %23 : vector<2x32xf32> to vector<2x1x32xf32>
    %25 = tpu.reciprocal %24 {approx = true} : vector<2x1x32xf32> -> vector<2x1x32xf32>
    %26 = vector.broadcast %25 : vector<2x1x32xf32> to vector<2x8x32xf32>
    %27 = arith.mulf %22, %26 : vector<2x8x32xf32>
    %28 = arith.mulf %27, %6 : vector<2x8x32xf32>
    %cst_10 = arith.constant dense<0.000000e+00> : vector<2x32xf32>
    %29 = vector.multi_reduction <add>, %28, %cst_10 [1] : vector<2x8x32xf32> to vector<2x32xf32>
    %c0_11 = arith.constant 0 : index
    %c0_12 = arith.constant 0 : index
    %30 = vector.load %arg3[%c0_11, %c0_12] : memref<32x32xf32, #tpu.memory_space<vmem>>, vector<32x32xf32>
    %cst_13 = arith.constant dense<0.000000e+00> : vector<2x32xf32>
    %31 = tpu.matmul %29, %30, %cst_13 {dimension_numbers = #tpu.dot_dimension_numbers<[1], [0], [0], [1], [0, 0, 1, 1], [], []>} : vector<2x32xf32>, vector<32x32xf32>, vector<2x32xf32> -> vector<2x32xf32>
    %c0_14 = arith.constant 0 : index
    %c0_15 = arith.constant 0 : index
    %32 = vector.load %arg4[%c0_14, %c0_15] : memref<1x32xf32, #tpu.memory_space<vmem>>, vector<1x32xf32>
    %33 = vector.broadcast %32 : vector<1x32xf32> to vector<2x32xf32>
    %34 = arith.addf %31, %33 : vector<2x32xf32>
    %c0_16 = arith.constant 0 : index
    %c0_17 = arith.constant 0 : index
    %35 = vector.load %arg5[%c0_16, %c0_17] : memref<2x32xf32, #tpu.memory_space<vmem>>, vector<2x32xf32>
    tpu.vector_store %arg5[%c0_16, %c0_17], %34 {strides = array<i32>} : memref<2x32xf32, #tpu.memory_space<vmem>>, vector<2x32xf32>,
    return
  }
}

</mosaic_0001>

<bundles_post_ra>
// kernel: tpu_custom_call.1
= control target key start
LH: loop header
LB: loop body
LE: loop exit
PB: predicated region body
PF: predicated region fallthrough
CT: control target
= control target key end

     0   :  { %10 = vsyncpa [#allocation3], 0  ;;  %s509_s0 = inlined_call_operand.hbm [shape: f32[2,8,32], index: 0, kind: input, shape index: {}]   ;;  %s510_s1 = inlined_call_operand.hbm [shape: f32[32,128], index: 1, kind: input, shape index: {}]   ;;  %s511_s2 = inlined_call_operand.hbm [shape: f32[32,32], index: 2, kind: input, shape index: {}]   ;;  %s512_s3 = inlined_call_operand.hbm [shape: f32[32,32], index: 3, kind: input, shape index: {}]   ;;  %s513_s4 = inlined_call_operand.vmem [shape: f32[1,32], index: 4, kind: input, shape index: {}]   ;;  %s514_s5 = inlined_call_operand.hbm [shape: f32[2,32], index: 5, kind: output, shape index: {}]  }
   0x1   :  { %11 = vsyncpa [#allocation6], 0 }
   0x2   :  { %12 = vsyncpa [#allocation9], 0 }
   0x3   :  { %13 = vsyncpa [#allocation4], 0  ;;  %s31_s20 = sshll.u32 %s510_s1, 4  ;;  %s441_s21 = smov [#allocation5]   ;;  %s32_s20 = int_to_ptr.hbm [resolvable:$true] %s31_s20 }
   0x4   :  { %s33_s22 = sshll.u32 %s441_s21, 4  ;;  %s18_s25 = sshll.u32 %s509_s0, 4  ;;  %s34_s22 = int_to_ptr.vmem [resolvable:$true] %s33_s22  ;;  %s19_s25 = int_to_ptr.hbm [resolvable:$true] %s18_s25 }
   0x5   :  { %s442_s26 = smov 128   ;;  %s443_s27 = smov 8  }
   0x6   :  { %39 = dma.hbm_to_vmem [thread:$0]  %s32_s20, 512, %s34_s22, [#allocation6], %s442_s26, %s442_s26, %s443_s27  }
   0x7   :  { %s444_s28 = smov [#allocation2]   ;;  %s44_s7 = sshll.u32 %s511_s2, 4  ;;  %s45_s7 = int_to_ptr.hbm [resolvable:$true] %s44_s7 }
   0x8   :  { %s20_s29 = sshll.u32 %s444_s28, 4  ;;  %s57_s9 = sshll.u32 %s512_s3, 4  ;;  %s21_s29 = int_to_ptr.vmem [resolvable:$true] %s20_s29  ;;  %s58_s9 = int_to_ptr.hbm [resolvable:$true] %s57_s9 }
   0x9   :  { %26 = dma.hbm_to_vmem [thread:$0]  %s19_s25, 256, %s21_s29, [#allocation3], %s442_s26, %s442_s26, %s443_s27  }
   0xa   :  { %s445_s10 = smov [#allocation7]   ;;  %s446_s0 = smov [#allocation8]  }
   0xb   :  { %s46_s11 = sshll.u32 %s445_s10, 4  ;;  %s59_s12 = sshll.u32 %s446_s0, 4  ;;  %s47_s11 = int_to_ptr.vmem [resolvable:$true] %s46_s11  ;;  %s60_s12 = int_to_ptr.vmem [resolvable:$true] %s59_s12 }
   0xc   :  { %52 = dma.hbm_to_vmem [thread:$0]  %s45_s7, 512, %s47_s11, [#allocation6], %s442_s26, %s442_s26, %s443_s27  }
   0xd   :  { %65 = dma.hbm_to_vmem [thread:$0]  %s58_s9, 512, %s60_s12, [#allocation9], %s442_s26, %s442_s26, %s443_s27  }
   0xe   :  { %433 = dma.done.wait [#allocation3], 256  }
   0xf   :  { %434 = vsyncadd [#allocation3], 4294967040 }
  0x10   :  { %435 = dma.done.wait [#allocation6], 1024  }
  0x11   :  { %436 = vsyncadd [#allocation6], 4294966272 }
  0x12   :  { %437 = dma.done.wait [#allocation9], 512  }
  0x13   :  { %438 = vsyncadd [#allocation9], 4294966784  ;;  %v89_v0 = vld [vmem:[#allocation5 + $0x18] sm:$0xff]  ;;  %v88_v1 = vld [vmem:[#allocation5 + $0x10] sm:$0xff]  ;;  %vm90_vm0 = vcmask 261120   ;;  %s447_s2 = smov 96  }
  0x14   :  { %109 = vmatpush.msra.mxu0 %v89_v0  ;;  %291 = vmatpush.msra.mxu3 %v89_v0  ;;  %v87_v2 = vld [vmem:[#allocation5 + $0x8] sm:$0xff]  ;;  %v86_v3 = vld [vmem:[#allocation5] sm:$0xff]  ;;  %v84_v4 = vld [vmem:[#allocation2] sm:$0xff]  ;;  %s448_s3 = smov 64   ;;  %vm241_vm1 = vcmask 1041409   ;;  %s449_s15 = smov [#allocation10]  }
  0x15   :  { %v85_v5 = vld [vmem:[#allocation2 + $0x8] sm:$0xff]  ;;  %v136_v9 = vld [vmem:[#allocation7 + $0x10] sm:$0xff]  ;;  %v135_v10 = vld [vmem:[#allocation7 + $0x8] sm:$0xff]  ;;  %s272_s16 = sshll.u32 %s449_s15, 4  ;;  %s274_s19 = sshll.u32 %s514_s5, 4  ;;  %vm265_vm2 = vcmask 254976   ;;  %s273_s16 = int_to_ptr.vmem [resolvable:$true] %s272_s16  ;;  %s275_s19 = int_to_ptr.hbm [resolvable:$true] %s274_s19 }
  0x16   :  { %110 = vmatpush.msra.mxu0 %v88_v1  ;;  %292 = vmatpush.msra.mxu3 %v88_v1  ;;  %v137_v8 = vld [vmem:[#allocation7 + $0x18] sm:$0xff]  ;;  %v134_v11 = vld [vmem:[#allocation7] sm:$0xff]  ;;  %v233_v42 = vld [vmem:[#allocation8 + $0x10] sm:$0xff] }
  0x17   :  { %160 = vmatpush.msra.mxu1 %v137_v8  ;;  %v234_v41 = vld [vmem:[#allocation8 + $0x18] sm:$0xff]  ;;  %v232_v46 = vld [vmem:[#allocation8 + $0x8] sm:$0xff]  ;;  %v231_v48 = vld [vmem:[#allocation8] sm:$0xff] }
  0x18   :  { %111 = vmatpush.msra.mxu0 %v87_v2  ;;  %293 = vmatpush.msra.mxu3 %v87_v2 }
  0x19   :  { %161 = vmatpush.msra.mxu1 %v136_v9  ;;  %257 = vmatpush.msra.mxu2 %v234_v41 }
  0x1a   :  { %112 = vmatpush.msra.mxu0 %v86_v3  ;;  %294 = vmatpush.msra.mxu3 %v86_v3 }
  0x1b   :  { %286 = vmatmul.msk.f32.vlgmr.msra.gmra.mxu0 %vm90_vm0, %v84_v4  ;;  %287 = vmatmul.msk.f32.vlgmr.msra.gmra.mxu3 %vm90_vm0, %v85_v5 }
  0x1c   :  { %162 = vmatpush.msra.mxu1 %v135_v10  ;;  %258 = vmatpush.msra.mxu2 %v233_v42 }
  0x1e   :  { %163 = vmatpush.msra.mxu1 %v134_v11  ;;  %259 = vmatpush.msra.mxu2 %v232_v46 }
  0x20   :  { %260 = vmatpush.msra.mxu2 %v231_v48 }
  0x98   :  { %v114_v6 = vpop.f32.mrf.mxu0 }
  0x99   :  { %209 = vrot.lane.b32.xlu2 %v114_v6, %s447_s2  ;;  %126 = vrot.lane.b32.xlu0 %v114_v6, %s448_s3  ;;  %v120_v12 = vmul.f32 0.35355338, %v114_v6 }
  0x9b   :  { %v122_v13 = vperm.slane %v120_v12, 0 }
  0x9e   :  { %v117_v7 = vpop.f32.mrf.mxu3 }
  0x9f   :  { %v121_v16 = vmul.f32 0.35355338, %v117_v7 }
  0xa1   :  { %211 = vrot.lane.b32.xlu2 %v117_v7, %s447_s2  ;;  %128 = vrot.lane.b32.xlu0 %v117_v7, %s448_s3  ;;  %v123_v17 = vperm.slane %v121_v16, 0 }
  0xf3   :  { %v210_v62 = vpop.permute.xlu2 %209 }
  0xfb   :  { %v212_v7 = vpop.permute.xlu2 %211 }
 0x10b   :  { %v127_v14 = vpop.permute.xlu0 %126 }
 0x10c   :  { %v132_v15 = vmul.f32 %v127_v14, %v122_v13 }
 0x10e   :  { %140 = vrot.lane.b32.xlu1 %v132_v15, %s448_s3 }
 0x113   :  { %v129_v18 = vpop.permute.xlu0 %128 }
 0x114   :  { %v133_v19 = vmul.f32 %v129_v18, %v123_v17 }
 0x116   :  { %142 = vrot.lane.b32.xlu1 %v133_v19, %s448_s3 }
 0x180   :  { %v141_v20 = vpop.permute.xlu1 %140 }
 0x181   :  { %288 = vmatmul.msk.f32.vlgmr.msra.gmra.mxu1 %vm90_vm0, %v141_v20 }
 0x188   :  { %v143_v21 = vpop.permute.xlu1 %142 }
 0x189   :  { %289 = vmatmul.msk.f32.gmra.mxu1 %vm90_vm0, %v143_v21  ;;  %v304_v21 = vld [vmem:[%s513_s4] ss:$0 sm:$0xff] }
 0x1fe   :  { %v165_v22 = vpop.f32.mrf.mxu1 }
 0x1ff   :  { %v171_v23 = vsel %vm90_vm0, %v165_v22, -inf }
 0x200   :  { %v172_v24 = vrot.slane %v171_v23, 4 }
 0x202   :  { %v173_v25 = vmax.f32 %v171_v23, %v172_v24 }
 0x204   :  { %v174_v26 = vrot.slane %v173_v25, 2 }
 0x206   :  { %v175_v27 = vmax.f32 %v173_v25, %v174_v26  ;;  %v168_v28 = vpop.f32.mrf.mxu1 }
 0x207   :  { %v178_v29 = vsel %vm90_vm0, %v168_v28, -inf }
 0x208   :  { %v176_v30 = vrot.slane %v175_v27, 1  ;;  %v179_v31 = vrot.slane %v178_v29, 4 }
 0x20a   :  { %v177_v32 = vmax.f32 %v175_v27, %v176_v30  ;;  %v180_v33 = vmax.f32 %v178_v29, %v179_v31 }
 0x20c   :  { %v185_v34 = vsub.f32 %v165_v22, %v177_v32  ;;  %v181_v35 = vrot.slane %v180_v33, 2 }
 0x20e   :  { %v187_v36 = vmul.f32 1.442695, %v185_v34  ;;  %v182_v37 = vmax.f32 %v180_v33, %v181_v35 }
 0x210   :  { %305 = vpow2.f32 %v187_v36  ;;  %v183_v38 = vrot.slane %v182_v37, 1 }
 0x212   :  { %v184_v39 = vmax.f32 %v182_v37, %v183_v38 }
 0x214   :  { %v186_v40 = vsub.f32 %v168_v28, %v184_v39 }
 0x216   :  { %v306_v43 = vpop.eup %305  ;;  %v189_v44 = vmul.f32 1.442695, %v186_v40 }
 0x217   :  { %v191_v45 = vsel %vm90_vm0, %v306_v43, 0.0 }
 0x218   :  { %v192_v47 = vrot.slane %v191_v45, 4  ;;  %307 = vpow2.f32 %v189_v44 }
 0x21a   :  { %v193_v49 = vadd.f32 %v192_v47, %v191_v45 }
 0x21c   :  { %v194_v50 = vrot.slane %v193_v49, 2 }
 0x21e   :  { %v308_v51 = vpop.eup %307  ;;  %v195_v52 = vadd.f32 %v194_v50, %v193_v49 }
 0x21f   :  { %v198_v53 = vsel %vm90_vm0, %v308_v51, 0.0 }
 0x220   :  { %v196_v54 = vrot.slane %v195_v52, 1  ;;  %v199_v55 = vrot.slane %v198_v53, 4 }
 0x222   :  { %v197_v56 = vadd.f32 %v196_v54, %v195_v52  ;;  %v200_v57 = vadd.f32 %v199_v55, %v198_v53 }
 0x224   :  { %309 = vrcp.f32 %v197_v56  ;;  %v201_v58 = vrot.slane %v200_v57, 2 }
 0x226   :  { %v202_v59 = vadd.f32 %v201_v58, %v200_v57 }
 0x228   :  { %v203_v60 = vrot.slane %v202_v59, 1 }
 0x22a   :  { %v310_v61 = vpop.eup %309  ;;  %v204_v63 = vadd.f32 %v203_v60, %v202_v59 }
 0x22b   :  { %v207_v0 = vmul.f32 %v310_v61, %v306_v43 }
 0x22c   :  { %311 = vrcp.f32 %v204_v63 }
 0x22d   :  { %v215_v1 = vmul.f32 %v210_v62, %v207_v0 }
 0x22f   :  { %v217_v2 = vsel %vm90_vm0, %v215_v1, 0.0 }
 0x230   :  { %v218_v3 = vrot.slane %v217_v2, 4 }
 0x232   :  { %v312_v4 = vpop.eup %311  ;;  %v219_v5 = vadd.f32 %v218_v3, %v217_v2 }
 0x233   :  { %v208_v6 = vmul.f32 %v312_v4, %v308_v51 }
 0x234   :  { %v220_v9 = vrot.slane %v219_v5, 2 }
 0x235   :  { %v216_v8 = vmul.f32 %v212_v7, %v208_v6 }
 0x236   :  { %v221_v12 = vadd.f32 %v220_v9, %v219_v5 }
 0x237   :  { %v224_v10 = vsel %vm90_vm0, %v216_v8, 0.0 }
 0x238   :  { %v225_v11 = vrot.slane %v224_v10, 4  ;;  %v222_v15 = vrot.slane %v221_v12, 1 }
 0x23a   :  { %v226_v13 = vadd.f32 %v225_v11, %v224_v10  ;;  %v223_v18 = vadd.f32 %v222_v15, %v221_v12 }
 0x23c   :  { %v227_v14 = vrot.slane %v226_v13, 2 }
 0x23e   :  { %v228_v16 = vadd.f32 %v227_v14, %v226_v13 }
 0x240   :  { %v229_v17 = vrot.slane %v228_v16, 1 }
 0x242   :  { %v230_v19 = vadd.f32 %v229_v17, %v228_v16 }
 0x244   :  { %v242_v20 = vsel %vm241_vm1, %v230_v19, %v223_v18 }
 0x245   :  { %290 = vmatmul.msk.f32.vlgmr.msra.gmra.mxu2 %vm90_vm0, %v242_v20 }
 0x2c8   :  { %v262_v22 = vpop.f32.mrf.mxu2 }
 0x2c9   :  { %v263_v23 = vadd.f32 %v304_v21, %v262_v22 }
 0x2cb   :  { %266 = vst.msk [vmem:[#allocation10] sm:$0x3] %vm265_vm2, %v263_v23 }
 0x2cc   :  { %277 = dma.vmem_to_hbm [thread:$0]  %s273_s16, 32, %s275_s19, [#allocation4]  }
 0x2cd   :  { %439 = dma.done.wait [#allocation4], 32  }
 0x2ce   :  { %440 = vsyncadd [#allocation4], 4294967264 }
 0x2cf   :  { %282 = vsyncpa [#allocation3], 1 }
 0x2d0   :  { %283 = vsyncpa [#allocation6], 1 }
 0x2d1   :  { %284 = vsyncpa [#allocation9], 1 }
 0x2d2   :  { %285 = vsyncpa [#allocation4], 1 }

</bundles_post_ra>
